<compile_context>
chip_gen: v7x
topology: tpu7x:2x2x1
jax: 0.10.0
libtpu: 0.0.40
codegen_flags: <defaults>
</compile_context>

<pallas_src>
import functools

import numpy as np
import jax
import jax.numpy as jnp
from jax.experimental import pallas as pl
from jax.experimental.pallas import tpu as pltpu


# ---------------------------------------------------------------------------
# Static gather construction (nearest-neighbor + crop), done once at trace time
# ---------------------------------------------------------------------------
def _nearest_indices(in_size, out_size):
    # PyTorch F.interpolate(mode='nearest'): src = floor(dst * in_size / out_size).
    # Integer arithmetic removes any float-rounding off-by-one risk at unusual ratios.
    idx = (np.arange(out_size, dtype=np.int64) * in_size) // out_size
    return np.minimum(idx, in_size - 1)


def _is_contiguous(idx):
    return np.array_equal(idx, np.arange(idx[0], idx[0] + len(idx)))


def _round_up(x, m):
    return ((x + m - 1) // m) * m


def _gather_matrix(h_idx, w_idx, in_h, in_w, padded_cols, dtype):
    """One-hot (H*W, padded_cols) matrix; columns beyond OH*OW are zero (lane padding)."""
    oh, ow = len(h_idx), len(w_idx)
    src = (h_idx[:, None] * in_w + w_idx[None, :]).reshape(-1)          # (OH*OW,)
    s = np.zeros((in_h * in_w, padded_cols), np.float32)
    s[src, np.arange(oh * ow)] = 1.0
    return jnp.asarray(s, dtype=dtype)


# ---------------------------------------------------------------------------
# VMEM budget + N*C tiling
# ---------------------------------------------------------------------------
def _vmem_limit_bytes():
    """Scoped-VMEM limit for this kernel: 32 MiB is safe on every generation
    (v5e/v6e: 128 MiB physical; v7x: 64 MiB physical with a 32 MiB default)."""
    try:
        phys = pltpu.get_tpu_info().vmem_capacity_bytes
    except Exception:
        phys = 64 * 1024 * 1024
    return max(16 * 1024 * 1024, min(32 * 1024 * 1024, phys // 2))


def _pick_nc_tiling(nc, row_bytes, fixed_bytes, budget):
    """Pick an N*C tile that divides nc, keeps the sublane dim a multiple of 8, fits the
    double-buffered blocks + gather matrices in `budget`, prefers an EVEN number of grid
    steps (v7x shards the 'parallel' axis across 2 TensorCores), and goes up to 1024 rows
    to amortize the ~0.35 us per-grid-step overhead."""
    candidates = (1024, 512, 256, 128, 64, 32, 16, 8)

    def fits(tile):
        return 2 * tile * row_bytes + fixed_bytes <= budget

    for tile in candidates:                            # even split across 2 TCs first
        if nc % tile == 0 and nc // tile >= 2 and (nc // tile) % 2 == 0 and fits(tile):
            return tile, nc // tile
    for tile in candidates:                            # any multi-step split
        if nc % tile == 0 and nc // tile >= 2 and fits(tile):
            return tile, nc // tile
    return nc, 1                                       # tiny inputs: one full (cheap) block


# ---------------------------------------------------------------------------
# Kernel: one grid axis over N*C tiles; all non-trivial feature levels per step
# ---------------------------------------------------------------------------
def _adjust_all_kernel(*refs, num_levels):
    x_refs = refs[:num_levels]
    s_refs = refs[num_levels:2 * num_levels]
    o_refs = refs[2 * num_levels:]
    for x_ref, s_ref, o_ref in zip(x_refs, s_refs, o_refs):
        x = x_ref[...]                                   # (NC_TILE, H*W)
        if x.dtype != s_ref.dtype:
            # TODO(synk): integer inputs round-trip through float; exact only up to 2^24.
            x = x.astype(s_ref.dtype)
        y = jnp.dot(x, s_ref[...], preferred_element_type=jnp.float32)  # (NC_TILE, OH*OW_pad)
        o_ref[...] = y.astype(o_ref.dtype)


# ---------------------------------------------------------------------------
# Wrappers matching the PyTorch modules
# ---------------------------------------------------------------------------
def adjust_all_sizes(features, out_size, crop=False):
    """Equivalent of AdjustAllSizesLayer(out_size, len(features)).forward(features, crop).

    `features` is a list of NCHW arrays sharing (N, C); returns a list of NCHW arrays.
    (AdjustSizeLayer has no learnable parameters, so there is nothing to initialize.)
    """
    num_levels = len(features)
    n, c = features[0].shape[:2]
    for f in features:
        assert f.shape[:2] == (n, c), "all feature levels must share (N, C)"
    nc = n * c

    do_crop = bool(crop) and out_size > 7
    # Matches PyTorch F.pad(x, [-c]*4) with c = int((out_size - 7) / 2): out_size=16 -> 8x8.
    pad_c = int((out_size - 7) / 2) if do_crop else 0
    oh = ow = out_size - 2 * pad_c
    padded_cols = _round_up(oh * ow, 128)       # lane-dense output rows (crop: 64 -> 128)

    results = [None] * num_levels
    kernel_levels = []                          # (level_index, feature, h_idx, w_idx)
    for li, f in enumerate(features):
        in_h, in_w = int(f.shape[2]), int(f.shape[3])
        h_idx = _nearest_indices(in_h, out_size)
        w_idx = _nearest_indices(in_w, out_size)
        if do_crop:
            h_idx = h_idx[pad_c:out_size - pad_c]
            w_idx = w_idx[pad_c:out_size - pad_c]
        if _is_contiguous(h_idx) and _is_contiguous(w_idx):
            # Identity / pure-slice level: no resampling needed.  Handling it in the wrapper
            # removes a full HBM read+write of this tensor plus its (largest-K) matmul.
            h0, w0 = int(h_idx[0]), int(w_idx[0])
            results[li] = f[:, :, h0:h0 + oh, w0:w0 + ow]
        else:
            kernel_levels.append((li, f, h_idx, w_idx))

    if not kernel_levels:
        return results

    out_dtype = kernel_levels[0][1].dtype
    # bf16 goes straight to the MXU at full rate on v5e/v6e/v7x; otherwise compute in f32.
    # TODO(synk): on v5e with f32 data the matmul can co-bind with HBM; a separable
    # (row-gather then col-gather) formulation would cut MXU work if that ever shows up.
    compute_dtype = jnp.bfloat16 if out_dtype == jnp.bfloat16 else jnp.float32
    cdt_bytes = jnp.dtype(compute_dtype).itemsize
    out_bytes = jnp.dtype(out_dtype).itemsize

    xs, mats = [], []
    for li, f, h_idx, w_idx in kernel_levels:
        in_h, in_w = int(f.shape[2]), int(f.shape[3])
        # Flatten to (N*C, H*W): lane axis = flattened spatial, sublane axis = channel tile.
        xs.append(f.reshape(nc, in_h * in_w))
        mats.append(_gather_matrix(h_idx, w_idx, in_h, in_w, padded_cols, compute_dtype))

    # VMEM budget: double-buffered input+output blocks plus the grid-invariant (but still
    # double-buffered) gather matrices, against a per-generation scoped-VMEM limit.
    # TODO(synk): for large out_size the (H*W, OH*OW) matrices grow quadratically; tile the
    # OH*OW axis as a second grid dimension before they approach the VMEM budget.
    vmem_limit = _vmem_limit_bytes()
    budget = vmem_limit - 4 * 1024 * 1024
    row_bytes = (sum(x.shape[1] * x.dtype.itemsize for x in xs)
                 + len(xs) * padded_cols * out_bytes)
    fixed_bytes = 2 * sum(m.shape[0] * m.shape[1] * cdt_bytes for m in mats)
    nc_tile, num_tiles = _pick_nc_tiling(nc, row_bytes, fixed_bytes, budget)

    in_specs = (
        [pl.BlockSpec((nc_tile, x.shape[1]), lambda t: (t, 0)) for x in xs]
        + [pl.BlockSpec(m.shape, lambda t: (0, 0)) for m in mats]
    )
    out_specs = tuple(pl.BlockSpec((nc_tile, padded_cols), lambda t: (t, 0)) for _ in xs)
    out_shape = tuple(jax.ShapeDtypeStruct((nc, padded_cols), out_dtype) for _ in xs)

    kernel = functools.partial(_adjust_all_kernel, num_levels=len(xs))
    outs = pl.pallas_call(
        kernel,
        out_shape=out_shape,
        grid=(num_tiles,),
        in_specs=in_specs,
        out_specs=out_specs,
        compiler_params=pltpu.CompilerParams(
            dimension_semantics=("parallel",),
            vmem_limit_bytes=vmem_limit),
    )(*xs, *mats)

    for (li, _, _, _), o in zip(kernel_levels, outs):
        if padded_cols != oh * ow:
            o = o[:, :oh * ow]                 # strip the lane padding added for dense stores
        results[li] = o.reshape(n, c, oh, ow)
    return results


def adjust_size(x, out_size, crop=False):
    """Equivalent of AdjustSizeLayer(out_size).forward(x, crop) for a single NCHW tensor."""
    return adjust_all_sizes([x], out_size, crop)[0]


# ---------------------------------------------------------------------------
# Plain numpy reference: F.interpolate(mode='nearest') + negative F.pad crop
# ---------------------------------------------------------------------------
def _reference(x, out_size, crop):
    n, c, h, w = x.shape
    h_idx = np.minimum((np.arange(out_size) * h) // out_size, h - 1)
    w_idx = np.minimum((np.arange(out_size) * w) // out_size, w - 1)
    y = np.asarray(x)[:, :, h_idx][:, :, :, w_idx]
    if crop and out_size > 7:
        p = int((out_size - 7) / 2)
        y = y[:, :, p:out_size - p, p:out_size - p]
    return y


if __name__ == "__main__":
    key = jax.random.PRNGKey(0)
    batch, channels = 2, 4
    out_size = 16
    spatial_sizes = [16, 12, 8]          # num_layers = 3, multi-scale features
    num_layers = len(spatial_sizes)

    keys = jax.random.split(key, num_layers)
    features = [
        jax.random.normal(k, (batch, channels, s, s), dtype=jnp.float32)
        for k, s in zip(keys, spatial_sizes)
    ]

    for crop in (False, True):
        outs = adjust_all_sizes(features, out_size, crop=crop)
        outs = [jax.block_until_ready(o) for o in outs]
        for f, o in zip(features, outs):
            ref = _reference(np.asarray(f), out_size, crop)
            assert o.shape == ref.shape, (o.shape, ref.shape)
            np.testing.assert_allclose(np.asarray(o), ref, rtol=1e-6, atol=1e-6)

    print("KERNEL_OK")
</pallas_src>

<mosaic_0001>
module attributes {stable_mosaic.version = 11 : i64} {
  func.func @_adjust_all_kernel(%arg0: i32, %arg1: memref<8x144xf32, #tpu.memory_space<vmem>>, %arg2: memref<8x64xf32, #tpu.memory_space<vmem>>, %arg3: memref<144x256xf32, #tpu.memory_space<vmem>>, %arg4: memref<64x256xf32, #tpu.memory_space<vmem>>, %arg5: memref<8x256xf32, #tpu.memory_space<vmem>>, %arg6: memref<8x256xf32, #tpu.memory_space<vmem>>) attributes {dimension_semantics = [#tpu.dimension_semantics<parallel>], iteration_bounds = array<i64: 1>, scalar_prefetch = 0 : i64, scratch_operands = 0 : i64, tpu.core_type = #tpu.core_type<tc>, window_params = [{transform_indices = @transform_0, window_bounds = array<i64: 8, 144>}, {transform_indices = @transform_1, window_bounds = array<i64: 8, 64>}, {pipeline_mode = #tpu.pipeline_mode<synchronous>, transform_indices = @transform_2, window_bounds = array<i64: 144, 256>}, {pipeline_mode = #tpu.pipeline_mode<synchronous>, transform_indices = @transform_3, window_bounds = array<i64: 64, 256>}, {transform_indices = @transform_4, window_bounds = array<i64: 8, 256>}, {transform_indices = @transform_5, window_bounds = array<i64: 8, 256>}]} {
    %c0 = arith.constant 0 : index
    %c0_0 = arith.constant 0 : index
    %0 = vector.load %arg1[%c0, %c0_0] : memref<8x144xf32, #tpu.memory_space<vmem>>, vector<8x144xf32>
    %c0_1 = arith.constant 0 : index
    %c0_2 = arith.constant 0 : index
    %1 = vector.load %arg3[%c0_1, %c0_2] : memref<144x256xf32, #tpu.memory_space<vmem>>, vector<144x256xf32>
    %cst = arith.constant dense<0.000000e+00> : vector<8x256xf32>
    %2 = tpu.matmul %0, %1, %cst {dimension_numbers = #tpu.dot_dimension_numbers<[1], [0], [0], [1], [0, 0, 1, 1], [], []>} : vector<8x144xf32>, vector<144x256xf32>, vector<8x256xf32> -> vector<8x256xf32>
    %c0_3 = arith.constant 0 : index
    %c0_4 = arith.constant 0 : index
    %3 = vector.load %arg5[%c0_3, %c0_4] : memref<8x256xf32, #tpu.memory_space<vmem>>, vector<8x256xf32>
    tpu.vector_store %arg5[%c0_3, %c0_4], %2 {strides = array<i32>} : memref<8x256xf32, #tpu.memory_space<vmem>>, vector<8x256xf32>,
    %c0_5 = arith.constant 0 : index
    %c0_6 = arith.constant 0 : index
    %4 = vector.load %arg2[%c0_5, %c0_6] : memref<8x64xf32, #tpu.memory_space<vmem>>, vector<8x64xf32>
    %c0_7 = arith.constant 0 : index
    %c0_8 = arith.constant 0 : index
    %5 = vector.load %arg4[%c0_7, %c0_8] : memref<64x256xf32, #tpu.memory_space<vmem>>, vector<64x256xf32>
    %cst_9 = arith.constant dense<0.000000e+00> : vector<8x256xf32>
    %6 = tpu.matmul %4, %5, %cst_9 {dimension_numbers = #tpu.dot_dimension_numbers<[1], [0], [0], [1], [0, 0, 1, 1], [], []>} : vector<8x64xf32>, vector<64x256xf32>, vector<8x256xf32> -> vector<8x256xf32>
    %c0_10 = arith.constant 0 : index
    %c0_11 = arith.constant 0 : index
    %7 = vector.load %arg6[%c0_10, %c0_11] : memref<8x256xf32, #tpu.memory_space<vmem>>, vector<8x256xf32>
    tpu.vector_store %arg6[%c0_10, %c0_11], %6 {strides = array<i32>} : memref<8x256xf32, #tpu.memory_space<vmem>>, vector<8x256xf32>,
    return
  }
  func.func @transform_0(%arg0: i32) -> (i32, i32) {
    %c0_i32 = arith.constant 0 : i32
    %c0_i32_0 = arith.constant 0 : i32
    return %arg0, %c0_i32 : i32, i32
  }
  func.func @transform_1(%arg0: i32) -> (i32, i32) {
    %c0_i32 = arith.constant 0 : i32
    %c0_i32_0 = arith.constant 0 : i32
    return %arg0, %c0_i32 : i32, i32
  }
  func.func @transform_2(%arg0: i32) -> (i32, i32) {
    %c0_i32 = arith.constant 0 : i32
    %c0_i32_0 = arith.constant 0 : i32
    %c0_i32_1 = arith.constant 0 : i32
    return %c0_i32, %c0_i32_0 : i32, i32
  }
  func.func @transform_3(%arg0: i32) -> (i32, i32) {
    %c0_i32 = arith.constant 0 : i32
    %c0_i32_0 = arith.constant 0 : i32
    %c0_i32_1 = arith.constant 0 : i32
    return %c0_i32, %c0_i32_0 : i32, i32
  }
  func.func @transform_4(%arg0: i32) -> (i32, i32) {
    %c0_i32 = arith.constant 0 : i32
    %c0_i32_0 = arith.constant 0 : i32
    return %arg0, %c0_i32 : i32, i32
  }
  func.func @transform_5(%arg0: i32) -> (i32, i32) {
    %c0_i32 = arith.constant 0 : i32
    %c0_i32_0 = arith.constant 0 : i32
    return %arg0, %c0_i32 : i32, i32
  }
}

</mosaic_0001>

<bundles_post_ra>
// kernel: tpu_custom_call.1
= control target key start
LH: loop header
LB: loop body
LE: loop exit
PB: predicated region body
PF: predicated region fallthrough
CT: control target
= control target key end

     0   :  { %11 = vsyncpa [#allocation3], 0  ;;  %s628_s0 = inlined_call_operand.hbm [shape: f32[8,144], index: 0, kind: input, shape index: {}]   ;;  %s629_s1 = inlined_call_operand.hbm [shape: f32[8,64], index: 1, kind: input, shape index: {}]   ;;  %s630_s2 = inlined_call_operand.hbm [shape: f32[144,256], index: 2, kind: input, shape index: {}]   ;;  %s631_s3 = inlined_call_operand.hbm [shape: f32[64,256], index: 3, kind: input, shape index: {}]   ;;  %s632_s4 = inlined_call_operand.hbm [shape: f32[8,256], index: 4, kind: output, shape index: {0}]   ;;  %s633_s5 = inlined_call_operand.hbm [shape: f32[8,256], index: 5, kind: output, shape index: {1}]  }
   0x1   :  { %12 = vsyncpa [#allocation6], 0 }
   0x2   :  { %13 = vsyncpa [#allocation9], 0 }
   0x3   :  { %14 = vsyncpa [#allocation4], 0 }
   0x4   :  { %15 = vsyncpa [#allocation12], 0  ;;  %s517_s18 = smov [#allocation5]   ;;  %s518_s20 = smov [#allocation2]  }
   0x5   :  { %s32_s19 = sshll.u32 %s517_s18, 4  ;;  %s22_s21 = sshll.u32 %s518_s20, 4  ;;  %s33_s19 = int_to_ptr.vmem [resolvable:$true] %s32_s19  ;;  %s23_s21 = int_to_ptr.vmem [resolvable:$true] %s22_s21 }
   0x6   :  { %s375_s24 = scalar_lea.hbm %s629_s1, 128 }
   0x7   :  { %p376_p0 = scmp.ne.s32.totalorder %s629_s1, %s375_s24  ;;  %p379_p1 = scmp.lt.u32.totalorder %s375_s24, %s629_s1 }
   0x9   :  { %p381_p2 = pnand %p379_p1, %p376_p0 }
   0xb   :  { %384 = shalt.err (!%p381_p2)
}
   0xc   :  { %s385_s29 = scalar_lea.vmem %s33_s19, 128  ;;  %p390_p4 = scmp.lt.s32.totalorder %s33_s19, %s33_s19 }
   0xd   :  { %p386_p3 = scmp.ne.s32.totalorder %s33_s19, %s385_s29  ;;  %p391_p5 = scmp.lt.s32.totalorder %s385_s29, %s385_s29 }
   0xf   :  { %p392_p6 = por %p391_p5, %p390_p4 }
  0x11   :  { %p393_p7 = pnand %p392_p6, %p386_p3 }
  0x13   :  { %396 = shalt.err (!%p393_p7)
}
  0x14   :  { %35 = dma.hbm_to_vmem [thread:$0]  %s629_s1, 128, %s33_s19, [#allocation6]  }
  0x15   :  { %s397_s9 = scalar_lea.hbm %s628_s0, 256 }
  0x16   :  { %p398_p8 = scmp.ne.s32.totalorder %s628_s0, %s397_s9  ;;  %p401_p9 = scmp.lt.u32.totalorder %s397_s9, %s628_s0 }
  0x18   :  { %p403_p10 = pnand %p401_p9, %p398_p8 }
  0x1a   :  { %406 = shalt.err (!%p403_p10)
}
  0x1b   :  { %s407_s14 = scalar_lea.vmem %s23_s21, 256  ;;  %p412_p12 = scmp.lt.s32.totalorder %s23_s21, %s23_s21 }
  0x1c   :  { %p408_p11 = scmp.ne.s32.totalorder %s23_s21, %s407_s14  ;;  %p413_p13 = scmp.lt.s32.totalorder %s407_s14, %s407_s14 }
  0x1e   :  { %p414_p0 = por %p413_p13, %p412_p12 }
  0x20   :  { %p415_p1 = pnand %p414_p0, %p408_p11 }
  0x22   :  { %418 = shalt.err (!%p415_p1)
}
  0x23   :  { %25 = dma.hbm_to_vmem [thread:$0]  %s628_s0, 256, %s23_s21, [#allocation3]  }
  0x24   :  { %s519_s16 = smov [#allocation7]   ;;  %s419_s20 = scalar_lea.hbm %s630_s2, 4608 }
  0x25   :  { %s41_s17 = sshll.u32 %s519_s16, 4  ;;  %p420_p2 = scmp.ne.s32.totalorder %s630_s2, %s419_s20  ;;  %s42_s17 = int_to_ptr.vmem [resolvable:$true] %s41_s17 }
  0x26   :  { %p423_p3 = scmp.lt.u32.totalorder %s419_s20, %s630_s2 }
  0x28   :  { %p425_p4 = pnand %p423_p3, %p420_p2 }
  0x2a   :  { %428 = shalt.err (!%p425_p4)
}
  0x2b   :  { %s429_s26 = scalar_lea.vmem %s42_s17, 4608  ;;  %p434_p6 = scmp.lt.s32.totalorder %s42_s17, %s42_s17 }
  0x2c   :  { %p430_p5 = scmp.ne.s32.totalorder %s42_s17, %s429_s26  ;;  %p435_p7 = scmp.lt.s32.totalorder %s429_s26, %s429_s26 }
  0x2e   :  { %p436_p8 = por %p435_p7, %p434_p6 }
  0x30   :  { %p437_p9 = pnand %p436_p8, %p430_p5 }
  0x32   :  { %440 = shalt.err (!%p437_p9)
}
  0x33   :  { %s520_s0 = smov 256   ;;  %s521_s21 = smov 16  }
  0x34   :  { %47 = dma.hbm_to_vmem [thread:$0]  %s630_s2, 4608, %s42_s17, [#allocation6], %s520_s0, %s520_s0, %s521_s21  }
  0x35   :  { %s522_s29 = smov [#allocation8]   ;;  %s441_s8 = scalar_lea.hbm %s631_s3, 2048 }
  0x36   :  { %s53_s30 = sshll.u32 %s522_s29, 4  ;;  %p442_p10 = scmp.ne.s32.totalorder %s631_s3, %s441_s8  ;;  %s54_s30 = int_to_ptr.vmem [resolvable:$true] %s53_s30 }
  0x37   :  { %p445_p11 = scmp.lt.u32.totalorder %s441_s8, %s631_s3 }
  0x39   :  { %p447_p12 = pnand %p445_p11, %p442_p10 }
  0x3b   :  { %450 = shalt.err (!%p447_p12)
}
  0x3c   :  { %s451_s13 = scalar_lea.vmem %s54_s30, 2048  ;;  %p456_p0 = scmp.lt.s32.totalorder %s54_s30, %s54_s30 }
  0x3d   :  { %p452_p13 = scmp.ne.s32.totalorder %s54_s30, %s451_s13  ;;  %p457_p1 = scmp.lt.s32.totalorder %s451_s13, %s451_s13 }
  0x3f   :  { %p458_p2 = por %p457_p1, %p456_p0 }
  0x41   :  { %p459_p3 = pnand %p458_p2, %p452_p13 }
  0x43   :  { %462 = shalt.err (!%p459_p3)
}
  0x44   :  { %59 = dma.hbm_to_vmem [thread:$0]  %s631_s3, 2048, %s54_s30, [#allocation9], %s520_s0, %s520_s0, %s521_s21  }
  0x45   :  { %507 = dma.done.wait [#allocation3], 256  }
  0x46   :  { %508 = vsyncadd [#allocation3], 4294967040 }
  0x47   :  { %509 = dma.done.wait [#allocation6], 4736  }
  0x48   :  { %510 = vsyncadd [#allocation6], 4294962560 }
  0x49   :  { %511 = dma.done.wait [#allocation9], 2048  }
  0x4a   :  { %512 = vsyncadd [#allocation9], 4294965248  ;;  %v523_v0 = vmov 0.0   ;;  %v75_v1 = vld [vmem:[#allocation7 + $0x8] sm:$0xff]  ;;  %v77_v2 = vld [vmem:[#allocation7 + $0x18] sm:$0xff]  ;;  %vm110_vm0 = vcmask 130048  }
  0x4b   :  { %272 = vmatprep.mubr.f32.mxu1 %v523_v0  ;;  %v74_v3 = vld [vmem:[#allocation7] sm:$0xff]  ;;  %v314_v4 = vpack.c.bf16 %v77_v2, %v75_v1  ;;  %v76_v5 = vld [vmem:[#allocation7 + $0x10] sm:$0xff]  ;;  %v79_v6 = vld [vmem:[#allocation7 + $0x28] sm:$0xff]  ;;  %vm204_vm1 = vcmask 523264   ;;  %s524_s3 = smov [#allocation11]  }
  0x4c   :  { %v81_v7 = vld [vmem:[#allocation7 + $0x38] sm:$0xff]  ;;  %v316_v8 = vpack.c.bf16 %v76_v5, %v74_v3  ;;  %v78_v10 = vld [vmem:[#allocation7 + $0x20] sm:$0xff]  ;;  %v80_v11 = vld [vmem:[#allocation7 + $0x30] sm:$0xff]  ;;  %s297_s1 = sshll.u32 %s524_s3, 4  ;;  %s298_s1 = int_to_ptr.vmem [resolvable:$true] %s297_s1 }
  0x4d   :  { %v318_v9 = vpack.c.bf16 %v81_v7, %v79_v6  ;;  %v83_v12 = vld [vmem:[#allocation7 + $0x48] sm:$0xff]  ;;  %315 = vmatprep.subr.bf16.mxu0 %v314_v4  ;;  %v85_v13 = vld [vmem:[#allocation7 + $0x58] sm:$0xff]  ;;  %v320_v14 = vpack.c.bf16 %v80_v11, %v78_v10  ;;  %v82_v16 = vld [vmem:[#allocation7 + $0x40] sm:$0xff]  ;;  %s463_s15 = scalar_lea.vmem %s298_s1, 256  ;;  %p468_p5 = scmp.lt.s32.totalorder %s298_s1, %s298_s1 }
  0x4e   :  { %317 = vmatpush1.bf16.msra.mxu0 %v316_v8  ;;  %v322_v15 = vpack.c.bf16 %v85_v13, %v83_v12  ;;  %v84_v17 = vld [vmem:[#allocation7 + $0x50] sm:$0xff]  ;;  %v87_v18 = vld [vmem:[#allocation7 + $0x68] sm:$0xff]  ;;  %v89_v19 = vld [vmem:[#allocation7 + $0x78] sm:$0xff]  ;;  %p464_p4 = scmp.ne.s32.totalorder %s298_s1, %s463_s15  ;;  %p469_p6 = scmp.lt.s32.totalorder %s463_s15, %s463_s15 }
  0x4f   :  { %319 = vmatprep.subr.bf16.mxu0 %v318_v9  ;;  %v189_v20 = vld [vmem:[#allocation8 + $0x8] sm:$0xff]  ;;  %v191_v21 = vld [vmem:[#allocation8 + $0x18] sm:$0xff]  ;;  %v324_v22 = vpack.c.bf16 %v84_v17, %v82_v16  ;;  %v86_v23 = vld [vmem:[#allocation7 + $0x60] sm:$0xff]  ;;  %v326_v27 = vpack.c.bf16 %v89_v19, %v87_v18 }
  0x50   :  { %v350_v24 = vpack.c.bf16 %v191_v21, %v189_v20  ;;  %v188_v25 = vld [vmem:[#allocation8] sm:$0xff]  ;;  %v190_v26 = vld [vmem:[#allocation8 + $0x10] sm:$0xff]  ;;  %v193_v30 = vld [vmem:[#allocation8 + $0x28] sm:$0xff]  ;;  %p470_p7 = por %p469_p6, %p468_p5 }
  0x51   :  { %v88_v28 = vld [vmem:[#allocation7 + $0x70] sm:$0xff]  ;;  %v352_v29 = vpack.c.bf16 %v190_v26, %v188_v25  ;;  %v195_v31 = vld [vmem:[#allocation8 + $0x38] sm:$0xff]  ;;  %v91_v32 = vld [vmem:[#allocation7 + $0x88] sm:$0xff] }
  0x52   :  { %321 = vmatpush1.bf16.msra.mxu0 %v320_v14  ;;  %v93_v33 = vld [vmem:[#allocation7 + $0x98] sm:$0xff]  ;;  %351 = vmatprep.subr.bf16.mxu1 %v350_v24  ;;  %v354_v34 = vpack.c.bf16 %v195_v31, %v193_v30  ;;  %v192_v35 = vld [vmem:[#allocation8 + $0x20] sm:$0xff]  ;;  %v194_v36 = vld [vmem:[#allocation8 + $0x30] sm:$0xff]  ;;  %v328_v37 = vpack.c.bf16 %v88_v28, %v86_v23  ;;  %p471_p8 = pnand %p470_p7, %p464_p4 }
  0x53   :  { %323 = vmatprep.subr.bf16.mxu0 %v322_v15  ;;  %353 = vmatpush1.bf16.msra.mxu1 %v352_v29  ;;  %v90_v38 = vld [vmem:[#allocation7 + $0x80] sm:$0xff]  ;;  %v356_v39 = vpack.c.bf16 %v194_v36, %v192_v35  ;;  %v197_v40 = vld [vmem:[#allocation8 + $0x48] sm:$0xff]  ;;  %v199_v41 = vld [vmem:[#allocation8 + $0x58] sm:$0xff]  ;;  %v330_v42 = vpack.c.bf16 %v93_v33, %v91_v32 }
  0x54   :  { %355 = vmatprep.subr.bf16.mxu1 %v354_v34  ;;  %v92_v43 = vld [vmem:[#allocation7 + $0x90] sm:$0xff]  ;;  %v358_v44 = vpack.c.bf16 %v199_v41, %v197_v40  ;;  %v196_v45 = vld [vmem:[#allocation8 + $0x40] sm:$0xff]  ;;  %v95_v47 = vld [vmem:[#allocation7 + $0xa8] sm:$0xff] }
  0x55   :  { %v198_v46 = vld [vmem:[#allocation8 + $0x50] sm:$0xff]  ;;  %v97_v48 = vld [vmem:[#allocation7 + $0xb8] sm:$0xff]  ;;  %v201_v49 = vld [vmem:[#allocation8 + $0x68] sm:$0xff]  ;;  %v332_v52 = vpack.c.bf16 %v92_v43, %v90_v38 }
  0x56   :  { %325 = vmatpush1.bf16.msra.mxu0 %v324_v22  ;;  %v360_v50 = vpack.c.bf16 %v198_v46, %v196_v45  ;;  %v203_v51 = vld [vmem:[#allocation8 + $0x78] sm:$0xff]  ;;  %v200_v54 = vld [vmem:[#allocation8 + $0x60] sm:$0xff]  ;;  %v202_v55 = vld [vmem:[#allocation8 + $0x70] sm:$0xff]  ;;  %v334_v56 = vpack.c.bf16 %v97_v48, %v95_v47 }
  0x57   :  { %327 = vmatprep.subr.bf16.mxu0 %v326_v27  ;;  %357 = vmatpush1.bf16.msra.mxu1 %v356_v39  ;;  %v362_v53 = vpack.c.bf16 %v203_v51, %v201_v49  ;;  %v94_v57 = vld [vmem:[#allocation7 + $0xa0] sm:$0xff]  ;;  %v96_v58 = vld [vmem:[#allocation7 + $0xb0] sm:$0xff]  ;;  %v99_v60 = vld [vmem:[#allocation7 + $0xc8] sm:$0xff]  ;;  %v364_v62 = vpack.c.bf16 %v202_v55, %v200_v54 }
  0x58   :  { %359 = vmatprep.subr.bf16.mxu1 %v358_v44  ;;  %v73_v59 = vld [vmem:[#allocation2 + $0x8] sm:$0xff]  ;;  %v101_v61 = vld [vmem:[#allocation7 + $0xd8] sm:$0xff]  ;;  %v336_v63 = vpack.c.bf16 %v96_v58, %v94_v57  ;;  %v98_v1 = vld [vmem:[#allocation7 + $0xc0] sm:$0xff] }
  0x59   :  { %312 = vmatprep.mubr.msk.f32.mxu0 %vm110_vm0, %v73_v59  ;;  %v338_v0 = vpack.c.bf16 %v101_v61, %v99_v60  ;;  %v100_v2 = vld [vmem:[#allocation7 + $0xd0] sm:$0xff]  ;;  %v103_v3 = vld [vmem:[#allocation7 + $0xe8] sm:$0xff]  ;;  %v105_v4 = vld [vmem:[#allocation7 + $0xf8] sm:$0xff] }
  0x5a   :  { %329 = vmatpush1.bf16.msra.mxu0 %v328_v37  ;;  %v187_v5 = vld [vmem:[#allocation5] sm:$0xff]  ;;  %v340_v6 = vpack.c.bf16 %v100_v2, %v98_v1  ;;  %v342_v7 = vpack.c.bf16 %v105_v4, %v103_v3  ;;  %v102_v8 = vld [vmem:[#allocation7 + $0xe0] sm:$0xff]  ;;  %v104_v9 = vld [vmem:[#allocation7 + $0xf0] sm:$0xff] }
  0x5b   :  { %331 = vmatprep.subr.bf16.mxu0 %v330_v42  ;;  %361 = vmatpush1.bf16.msra.mxu1 %v360_v50  ;;  %v107_v10 = vld [vmem:[#allocation7 + $0x108] sm:$0xff]  ;;  %v109_v11 = vld [vmem:[#allocation7 + $0x118] sm:$0xff]  ;;  %v344_v12 = vpack.c.bf16 %v104_v9, %v102_v8  ;;  %v106_v14 = vld [vmem:[#allocation7 + $0x100] sm:$0xff] }
  0x5c   :  { %363 = vmatprep.subr.bf16.mxu1 %v362_v53  ;;  %v346_v13 = vpack.c.bf16 %v109_v11, %v107_v10  ;;  %v108_v15 = vld [vmem:[#allocation7 + $0x110] sm:$0xff]  ;;  %v72_v17 = vld [vmem:[#allocation2] sm:$0xff] }
  0x5d   :  { %v348_v16 = vpack.c.bf16 %v108_v15, %v106_v14 }
  0x5e   :  { %333 = vmatpush1.bf16.msra.mxu0 %v332_v52 }
  0x5f   :  { %335 = vmatprep.subr.bf16.mxu0 %v334_v56  ;;  %365 = vmatpush1.bf16.msra.mxu1 %v364_v62 }
  0x62   :  { %337 = vmatpush1.bf16.msra.mxu0 %v336_v63  ;;  %313 = vmatmul.mubr.msk.f32.vlgmr.msra.gmra.mrb[0].mxu1 %vm204_vm1, %v187_v5 }
  0x63   :  { %339 = vmatprep.subr.bf16.mxu0 %v338_v0 }
  0x66   :  { %341 = vmatpush1.bf16.msra.mxu0 %v340_v6 }
  0x67   :  { %343 = vmatprep.subr.bf16.mxu0 %v342_v7 }
  0x6a   :  { %345 = vmatpush1.bf16.msra.mxu0 %v344_v12 }
  0x6b   :  { %347 = vmatprep.subr.bf16.mxu0 %v346_v13 }
  0x6e   :  { %349 = vmatpush1.bf16.msra.mxu0 %v348_v16 }
  0x71   :  { %179 = vmatmul.mubr.f32.vlgmr.msra.gmra.mrb[0].mxu0 %v72_v17 }
 0x135   :  { %v274_v18 = vpop.f32.mrb[0].mxu1 }
 0x136   :  { %279 = vst [vmem:[#allocation11] sm:$0xff] %v274_v18  ;;  %v276_v19 = vpop.f32.mrb[1].mxu1 }
 0x137   :  { %280 = vst [vmem:[#allocation11 + $0x8] sm:$0xff] %v276_v19 }
 0x138   :  { %474 = shalt.err (!%p471_p8)
}
 0x139   :  { %s475_s18 = scalar_lea.hbm %s633_s5, 256 }
 0x13a   :  { %p476_p9 = scmp.ne.s32.totalorder %s633_s5, %s475_s18  ;;  %p479_p10 = scmp.lt.u32.totalorder %s475_s18, %s633_s5 }
 0x13c   :  { %p481_p11 = pnand %p479_p10, %p476_p9 }
 0x13e   :  { %484 = shalt.err (!%p481_p11)
}
 0x13f   :  { %300 = dma.vmem_to_hbm [thread:$0]  %s298_s1, 256, %s633_s5, [#allocation12]  }
 0x140   :  { %s525_s26 = smov [#allocation10]  }
 0x141   :  { %s287_s0 = sshll.u32 %s525_s26, 4  ;;  %s288_s0 = int_to_ptr.vmem [resolvable:$true] %s287_s0 }
 0x142   :  { %s485_s21 = scalar_lea.vmem %s288_s0, 256  ;;  %p490_p13 = scmp.lt.s32.totalorder %s288_s0, %s288_s0 }
 0x143   :  { %p486_p12 = scmp.ne.s32.totalorder %s288_s0, %s485_s21  ;;  %p491_p0 = scmp.lt.s32.totalorder %s485_s21, %s485_s21 }
 0x144   :  { %v180_v20 = vpop.f32.mrb[0].mxu0 }
 0x145   :  { %185 = vst [vmem:[#allocation10] sm:$0xff] %v180_v20  ;;  %v182_v21 = vpop.f32.mrb[1].mxu0  ;;  %p492_p1 = por %p491_p0, %p490_p13 }
 0x146   :  { %186 = vst [vmem:[#allocation10 + $0x8] sm:$0xff] %v182_v21 }
 0x147   :  { %p493_p2 = pnand %p492_p1, %p486_p12 }
 0x149   :  { %496 = shalt.err (!%p493_p2)
}
 0x14a   :  { %s497_s29 = scalar_lea.hbm %s632_s4, 256 }
 0x14b   :  { %p498_p3 = scmp.ne.s32.totalorder %s632_s4, %s497_s29  ;;  %p501_p4 = scmp.lt.u32.totalorder %s497_s29, %s632_s4 }
 0x14d   :  { %p503_p5 = pnand %p501_p4, %p498_p3 }
 0x14f   :  { %506 = shalt.err (!%p503_p5)
}
 0x150   :  { %290 = dma.vmem_to_hbm [thread:$0]  %s288_s0, 256, %s632_s4, [#allocation4]  }
 0x151   :  { %513 = dma.done.wait [#allocation4], 256  }
 0x152   :  { %514 = vsyncadd [#allocation4], 4294967040 }
 0x153   :  { %515 = dma.done.wait [#allocation12], 256  }
 0x154   :  { %516 = vsyncadd [#allocation12], 4294967040 }
 0x155   :  { %307 = vsyncpa [#allocation3], 1 }
 0x156   :  { %308 = vsyncpa [#allocation6], 1 }
 0x157   :  { %309 = vsyncpa [#allocation9], 1 }
 0x158   :  { %310 = vsyncpa [#allocation4], 1 }
 0x159   :  { %311 = vsyncpa [#allocation12], 1 }

</bundles_post_ra>
